<compile_context>
chip_gen: v7x
topology: tpu7x:2x2x1
jax: 0.10.0
libtpu: 0.0.40
codegen_flags: <defaults>
</compile_context>

<pallas_src>
import functools

import jax
import jax.numpy as jnp
from jax.experimental import pallas as pl
from jax.experimental.pallas import tpu as pltpu


def typenet_kernel(tgt_ref,                 # VMEM [B+1, 1] int32 (row B is padding)
                   x_ref,                   # [N, F]   mxu dtype
                   w_n2l_ref, b_n2l_ref,    # [F, E] mxu, [1, E] f32
                   wqk_t_ref,               # [E, E] mxu  = (Wq[:E] @ Wk^T)/sqrt(E)
                   wqk_g_ref,               # [E, E] mxu  = (Wq[E:] @ Wk^T)/sqrt(E)
                   bqk_ref,                 # [1, E] f32  = (bq @ Wk^T)/sqrt(E)
                   wvo_ref, bvo_ref,        # [E, R] mxu = Wv@Wo, [1, R] f32 = bv@Wo+bo
                   out_ref):                # [B, R] f32
    N = x_ref.shape[0]
    E = w_n2l_ref.shape[1]
    B = out_ref.shape[0]
    mxu_dt = w_n2l_ref.dtype

    # node embedding: relu(X @ W + b)  -- f32 accumulation, f32 VPU work
    h = jnp.dot(x_ref[...], w_n2l_ref[...], preferred_element_type=jnp.float32)
    h = jnp.maximum(h + b_n2l_ref[...], 0.0)                          # [N, E] f32
    h_mxu = h.astype(mxu_dt)

    # Selector matmul: rows 0..B-1 one-hot(target_b), row B = 1/N (graph mean).
    # One MXU push replaces B scalar-addressed gathers + concat + XLU mean.
    row = jax.lax.broadcasted_iota(jnp.int32, (B + 1, N), 0)
    col = jax.lax.broadcasted_iota(jnp.int32, (B + 1, N), 1)
    onehot = (col == tgt_ref[...]).astype(jnp.float32)                 # [B+1, N]
    sel = jnp.where(row == B, jnp.float32(1.0 / N), onehot)           # [B+1, N]
    emb = jnp.dot(sel.astype(mxu_dt), h_mxu,
                  preferred_element_type=jnp.float32)                  # [B+1, E]
    tgt_embed = emb[:B]                                                # [B, E] f32
    graph_embed = emb[B:B + 1]                                         # [1, E] f32

    # qk = (cat(tgt, graph) @ Wq + bq) @ Wk^T / sqrt(E)  with Wq@Wk^T folded
    # offline and split: the graph half (identical for every target) is one
    # [1,E] row, broadcast-added to the per-target half.  bk dropped (softmax
    # shift); bqk kept (it contracts with h[n]); 1/sqrt(E) folded into weights.
    g_row = jnp.dot(graph_embed.astype(mxu_dt), wqk_g_ref[...],
                    preferred_element_type=jnp.float32) + bqk_ref[...]  # [1, E]
    qk = jnp.dot(tgt_embed.astype(mxu_dt), wqk_t_ref[...],
                 preferred_element_type=jnp.float32) + g_row            # [B, E]

    # scores = qk @ h^T ; softmax over nodes (approx reciprocal on the EUP slot)
    scores = jax.lax.dot_general(qk.astype(mxu_dt), h_mxu,
                                 dimension_numbers=(((1,), (1,)), ((), ())),
                                 preferred_element_type=jnp.float32)    # [B, N]
    scores = scores - jnp.max(scores, axis=-1, keepdims=True)
    e = jnp.exp(scores)
    attn = e * pl.reciprocal(jnp.sum(e, axis=-1, keepdims=True), approx=True)

    # logits = (attn @ h) @ (Wv @ Wo) + (bv @ Wo + bo)
    #   -- valid re-association since sum(attn) == 1 (value/output folds offline).
    pooled = jnp.dot(attn.astype(mxu_dt), h_mxu,
                     preferred_element_type=jnp.float32)                # [B, E]
    logits = jnp.dot(pooled.astype(mxu_dt), wvo_ref[...],
                     preferred_element_type=jnp.float32) + bvo_ref[...]  # [B, R]

    # output softmax over region actions: exact division (sum-to-1 at 1e-4)
    logits = logits - jnp.max(logits, axis=-1, keepdims=True)
    el = jnp.exp(logits)
    out_ref[...] = el / jnp.sum(el, axis=-1, keepdims=True)


def prepare_params(params, mxu_dtype=jnp.bfloat16):
    """Offline (once per parameter set) weight folding + MXU-dtype casting.

    Folds key_proj into query_proj and output_layer into value_proj, pre-scales
    by 1/sqrt(E), drops bk (softmax-shift-invariant), and caches bf16 copies so
    typenet_forward does zero per-call casting.
    """
    E = params["wk"].shape[0]
    inv_sqrt_e = jnp.float32(1.0 / (float(E) ** 0.5))
    wqk = (params["wq"] @ params["wk"].T) * inv_sqrt_e        # [2E, E]
    bqk = (params["bq"] @ params["wk"].T) * inv_sqrt_e        # [1, E]   (kept!)
    wvo = params["wv"] @ params["wo"]                         # [E, R]
    bvo = params["bv"] @ params["wo"] + params["bo"]          # [1, R]
    return dict(
        w_n2l=params["w_n2l"].astype(mxu_dtype),
        b_n2l=params["b_n2l"].astype(jnp.float32),
        wqk_t=wqk[:E].astype(mxu_dtype),
        wqk_g=wqk[E:].astype(mxu_dtype),
        bqk=bqk.astype(jnp.float32),
        wvo=wvo.astype(mxu_dtype),
        bvo=bvo.astype(jnp.float32),
    )


@jax.jit
def typenet_forward(targets, x_mxu, prep):
    """Batched TypeNet forward: one fused pallas_call for B target nodes.

    `x_mxu` is the (already MXU-dtype-cast) node-feature matrix; `prep` is the
    output of prepare_params.  Returns [B, R] action probabilities (or [R] for a
    scalar target), matching softmax(output_layer(context)).squeeze() per target.
    """
    single = jnp.ndim(targets) == 0
    targets = jnp.atleast_1d(targets).astype(jnp.int32)
    B = targets.shape[0]
    N, F = x_mxu.shape
    E = prep["w_n2l"].shape[1]
    R = prep["wvo"].shape[1]

    # [B+1, 1] target ids; the padded last row feeds the 1/N graph-mean selector
    # row inside the kernel (its value is ignored).
    tgt_pad = jnp.pad(targets, (0, 1)).reshape(B + 1, 1)

    tensor_inputs = (
        tgt_pad,
        x_mxu,
        prep["w_n2l"], prep["b_n2l"],
        prep["wqk_t"], prep["wqk_g"], prep["bqk"],
        prep["wvo"], prep["bvo"],
    )

    vmem = pl.BlockSpec(memory_space=pltpu.MemorySpace.VMEM)
    cost = pl.CostEstimate(
        flops=2 * (N * F * E                    # node embedding
                   + (B + 1) * N * E            # selector matmul
                   + E * E                      # graph-half qk row
                   + B * (E * E + E * N + N * E + E * R)),
        transcendentals=B * (N + R) + B,
        bytes_accessed=(sum(int(a.size) * a.dtype.itemsize for a in tensor_inputs)
                        + B * R * 4),
    )

    probs = pl.pallas_call(
        typenet_kernel,
        out_shape=jax.ShapeDtypeStruct((B, R), jnp.float32),
        in_specs=[vmem] * len(tensor_inputs),
        out_specs=vmem,
        cost_estimate=cost,
    )(*tensor_inputs)
    return probs[0] if single else probs


def make_params(key, F, E, R):
    """Deterministic glorot-uniform init mirroring the torch weights_init."""
    def glorot(k, shape):
        fan_in, fan_out = shape
        limit = (6.0 / (fan_in + fan_out)) ** 0.5
        return jax.random.uniform(k, shape, jnp.float32, -limit, limit)

    ks = jax.random.split(key, 6)
    w_n2l = glorot(ks[0], (F, E))
    lim_b = (6.0 / (2.0 * E)) ** 0.5                 # 1-D Parameter branch of glorot_uniform
    b_n2l = jax.random.uniform(ks[1], (1, E), jnp.float32, -lim_b, lim_b)
    wq = glorot(ks[2], (2 * E, E))                   # query_proj weight, stored [in, out]
    wk = glorot(ks[3], (E, E))
    wv = glorot(ks[4], (E, E))
    wo = glorot(ks[5], (E, R))
    zeros = lambda n: jnp.zeros((1, n), jnp.float32)  # nn.Linear biases are zeroed
    return dict(w_n2l=w_n2l, b_n2l=b_n2l,
                wq=wq, bq=zeros(E),
                wk=wk, bk=zeros(E),
                wv=wv, bv=zeros(E),
                wo=wo, bo=zeros(R))


def typenet_reference(target_node, x, p):
    """Pure-JAX f32 reference of the ORIGINAL (un-rewritten, un-folded) math."""
    h = jnp.maximum(x @ p["w_n2l"] + p["b_n2l"], 0.0)
    tgt = h[target_node][None, :]
    gm = jnp.mean(h, axis=0, keepdims=True)
    q = jnp.concatenate([tgt, gm], axis=1) @ p["wq"] + p["bq"]
    k = h @ p["wk"] + p["bk"]
    v = h @ p["wv"] + p["bv"]
    s = (q @ k.T) / jnp.sqrt(jnp.float32(q.shape[-1]))
    a = jax.nn.softmax(s, axis=-1)
    ctx = a @ v
    return jax.nn.softmax(ctx @ p["wo"] + p["bo"], axis=-1)[0]


if __name__ == "__main__":
    N, F, E, R = 64, 32, 32, 8     # nodes, node_features dim, embed_dim, region_length
    B = 8                          # batch of target nodes per pallas_call (sublane fill)

    key = jax.random.PRNGKey(0)
    k_feat, k_par, k_tgt, k_bias = jax.random.split(key, 4)
    node_features = jax.random.normal(k_feat, (N, F), jnp.float32)
    x_mxu = node_features.astype(jnp.bfloat16)     # cast once; reuse across calls
    targets = jax.random.randint(k_tgt, (B,), 0, N, dtype=jnp.int32)

    # (a) torch-style init (nn.Linear biases zeroed), (b) nonzero biases to
    # exercise the bq/bk/bv/bo folds (bqk kept, bk dropped, bvo folded).
    params_zero = make_params(k_par, F, E, R)
    kb = jax.random.split(k_bias, 4)
    params_nz = dict(params_zero,
                     bq=0.1 * jax.random.normal(kb[0], (1, E), jnp.float32),
                     bk=0.1 * jax.random.normal(kb[1], (1, E), jnp.float32),
                     bv=0.1 * jax.random.normal(kb[2], (1, E), jnp.float32),
                     bo=0.1 * jax.random.normal(kb[3], (1, R), jnp.float32))

    for name, p in (("zero_bias", params_zero), ("nonzero_bias", params_nz)):
        prep = prepare_params(p)                   # offline fold + bf16 cast (once)
        probs = jax.block_until_ready(typenet_forward(targets, x_mxu, prep))
        ref = jnp.stack([typenet_reference(int(t), node_features, p)
                         for t in targets])
        assert probs.shape == (B, R), (name, probs.shape)
        assert jnp.allclose(jnp.sum(probs, axis=-1), 1.0, atol=1e-4), name
        # bf16 matmul operands (f32 accumulation) vs. full-f32 reference -> loose atol
        assert jnp.allclose(probs, ref, atol=2e-2), (
            name, float(jnp.max(jnp.abs(probs - ref))))

    # scalar-target path (B=1)
    prep = prepare_params(params_nz)
    p1 = jax.block_until_ready(typenet_forward(targets[0], x_mxu, prep))
    ref1 = typenet_reference(int(targets[0]), node_features, params_nz)
    assert p1.shape == (R,)
    assert jnp.allclose(p1, ref1, atol=2e-2)

    print("KERNEL_OK")
</pallas_src>

<mosaic_0001>
module attributes {stable_mosaic.version = 11 : i64} {
  func.func @typenet_kernel(%arg0: memref<9x1xi32, #tpu.memory_space<vmem>>, %arg1: memref<64x32xbf16, #tpu.memory_space<vmem>>, %arg2: memref<32x32xbf16, #tpu.memory_space<vmem>>, %arg3: memref<1x32xf32, #tpu.memory_space<vmem>>, %arg4: memref<32x32xbf16, #tpu.memory_space<vmem>>, %arg5: memref<32x32xbf16, #tpu.memory_space<vmem>>, %arg6: memref<1x32xf32, #tpu.memory_space<vmem>>, %arg7: memref<32x8xbf16, #tpu.memory_space<vmem>>, %arg8: memref<1x8xf32, #tpu.memory_space<vmem>>, %arg9: memref<8x8xf32, #tpu.memory_space<vmem>>) attributes {dimension_semantics = [], scalar_prefetch = 0 : i64, scratch_operands = 0 : i64, tpu.core_type = #tpu.core_type<tc>} {
    %c0 = arith.constant 0 : index
    %c0_0 = arith.constant 0 : index
    %0 = vector.load %arg1[%c0, %c0_0] : memref<64x32xbf16, #tpu.memory_space<vmem>>, vector<64x32xbf16>
    %c0_1 = arith.constant 0 : index
    %c0_2 = arith.constant 0 : index
    %1 = vector.load %arg2[%c0_1, %c0_2] : memref<32x32xbf16, #tpu.memory_space<vmem>>, vector<32x32xbf16>
    %cst = arith.constant dense<0.000000e+00> : vector<64x32xf32>
    %2 = tpu.matmul %0, %1, %cst {dimension_numbers = #tpu.dot_dimension_numbers<[1], [0], [0], [1], [0, 0, 1, 1], [], []>} : vector<64x32xbf16>, vector<32x32xbf16>, vector<64x32xf32> -> vector<64x32xf32>
    %c0_3 = arith.constant 0 : index
    %c0_4 = arith.constant 0 : index
    %3 = vector.load %arg3[%c0_3, %c0_4] : memref<1x32xf32, #tpu.memory_space<vmem>>, vector<1x32xf32>
    %4 = vector.broadcast %3 : vector<1x32xf32> to vector<64x32xf32>
    %5 = arith.addf %2, %4 : vector<64x32xf32>
    %cst_5 = arith.constant 0.000000e+00 : f32
    %6 = vector.broadcast %cst_5 : f32 to vector<64x32xf32>
    %7 = arith.maximumf %5, %6 : vector<64x32xf32>
    %8 = arith.truncf %7 : vector<64x32xf32> to vector<64x32xbf16>
    %9 = tpu.iota {dimensions = array<i32: 0>} : vector<9x64xi32>
    %10 = tpu.iota {dimensions = array<i32: 1>} : vector<9x64xi32>
    %c0_6 = arith.constant 0 : index
    %c0_7 = arith.constant 0 : index
    %11 = vector.load %arg0[%c0_6, %c0_7] : memref<9x1xi32, #tpu.memory_space<vmem>>, vector<9x1xi32>
    %12 = vector.broadcast %11 : vector<9x1xi32> to vector<9x64xi32>
    %13 = arith.cmpi eq, %10, %12 : vector<9x64xi32>
    %14 = arith.extui %13 : vector<9x64xi1> to vector<9x64xi32>
    %15 = arith.sitofp %14 : vector<9x64xi32> to vector<9x64xf32>
    %c8_i32 = arith.constant 8 : i32
    %16 = vector.broadcast %c8_i32 : i32 to vector<9x64xi32>
    %17 = arith.cmpi eq, %9, %16 : vector<9x64xi32>
    %cst_8 = arith.constant 1.562500e-02 : f32
    %18 = vector.broadcast %cst_8 : f32 to vector<9x64xf32>
    %19 = arith.select %17, %18, %15 : vector<9x64xi1>, vector<9x64xf32>
    %20 = arith.truncf %19 : vector<9x64xf32> to vector<9x64xbf16>
    %cst_9 = arith.constant dense<0.000000e+00> : vector<9x32xf32>
    %21 = tpu.matmul %20, %8, %cst_9 {dimension_numbers = #tpu.dot_dimension_numbers<[1], [0], [0], [1], [0, 0, 1, 1], [], []>} : vector<9x64xbf16>, vector<64x32xbf16>, vector<9x32xf32> -> vector<9x32xf32>
    %22 = vector.extract_strided_slice %21 {offsets = [0, 0], sizes = [8, 32], strides = [1, 1]} : vector<9x32xf32> to vector<8x32xf32>
    %23 = vector.extract_strided_slice %21 {offsets = [8, 0], sizes = [1, 32], strides = [1, 1]} : vector<9x32xf32> to vector<1x32xf32>
    %24 = arith.truncf %23 : vector<1x32xf32> to vector<1x32xbf16>
    %c0_10 = arith.constant 0 : index
    %c0_11 = arith.constant 0 : index
    %25 = vector.load %arg5[%c0_10, %c0_11] : memref<32x32xbf16, #tpu.memory_space<vmem>>, vector<32x32xbf16>
    %cst_12 = arith.constant dense<0.000000e+00> : vector<1x32xf32>
    %26 = tpu.matmul %24, %25, %cst_12 {dimension_numbers = #tpu.dot_dimension_numbers<[1], [0], [0], [1], [0, 0, 1, 1], [], []>} : vector<1x32xbf16>, vector<32x32xbf16>, vector<1x32xf32> -> vector<1x32xf32>
    %c0_13 = arith.constant 0 : index
    %c0_14 = arith.constant 0 : index
    %27 = vector.load %arg6[%c0_13, %c0_14] : memref<1x32xf32, #tpu.memory_space<vmem>>, vector<1x32xf32>
    %28 = arith.addf %26, %27 : vector<1x32xf32>
    %29 = arith.truncf %22 : vector<8x32xf32> to vector<8x32xbf16>
    %c0_15 = arith.constant 0 : index
    %c0_16 = arith.constant 0 : index
    %30 = vector.load %arg4[%c0_15, %c0_16] : memref<32x32xbf16, #tpu.memory_space<vmem>>, vector<32x32xbf16>
    %cst_17 = arith.constant dense<0.000000e+00> : vector<8x32xf32>
    %31 = tpu.matmul %29, %30, %cst_17 {dimension_numbers = #tpu.dot_dimension_numbers<[1], [0], [0], [1], [0, 0, 1, 1], [], []>} : vector<8x32xbf16>, vector<32x32xbf16>, vector<8x32xf32> -> vector<8x32xf32>
    %32 = vector.broadcast %28 : vector<1x32xf32> to vector<8x32xf32>
    %33 = arith.addf %31, %32 : vector<8x32xf32>
    %34 = arith.truncf %33 : vector<8x32xf32> to vector<8x32xbf16>
    %cst_18 = arith.constant dense<0.000000e+00> : vector<8x64xf32>
    %35 = tpu.matmul %34, %8, %cst_18 {dimension_numbers = #tpu.dot_dimension_numbers<[1], [1], [0], [0], [0, 0, 1, 0], [], []>} : vector<8x32xbf16>, vector<64x32xbf16>, vector<8x64xf32> -> vector<8x64xf32>
    %cst_19 = arith.constant dense<0xFF800000> : vector<8xf32>
    %36 = vector.multi_reduction <maximumf>, %35, %cst_19 [1] : vector<8x64xf32> to vector<8xf32>
    %37 = vector.shape_cast %36 : vector<8xf32> to vector<8x1xf32>
    %38 = vector.broadcast %37 : vector<8x1xf32> to vector<8x64xf32>
    %39 = arith.subf %35, %38 : vector<8x64xf32>
    %40 = math.exp %39 : vector<8x64xf32>
    %cst_20 = arith.constant dense<0.000000e+00> : vector<8xf32>
    %41 = vector.multi_reduction <add>, %40, %cst_20 [1] : vector<8x64xf32> to vector<8xf32>
    %42 = vector.shape_cast %41 : vector<8xf32> to vector<8x1xf32>
    %43 = tpu.reciprocal %42 {approx = true} : vector<8x1xf32> -> vector<8x1xf32>
    %44 = vector.broadcast %43 : vector<8x1xf32> to vector<8x64xf32>
    %45 = arith.mulf %40, %44 : vector<8x64xf32>
    %46 = arith.truncf %45 : vector<8x64xf32> to vector<8x64xbf16>
    %cst_21 = arith.constant dense<0.000000e+00> : vector<8x32xf32>
    %47 = tpu.matmul %46, %8, %cst_21 {dimension_numbers = #tpu.dot_dimension_numbers<[1], [0], [0], [1], [0, 0, 1, 1], [], []>} : vector<8x64xbf16>, vector<64x32xbf16>, vector<8x32xf32> -> vector<8x32xf32>
    %48 = arith.truncf %47 : vector<8x32xf32> to vector<8x32xbf16>
    %c0_22 = arith.constant 0 : index
    %c0_23 = arith.constant 0 : index
    %49 = vector.load %arg7[%c0_22, %c0_23] : memref<32x8xbf16, #tpu.memory_space<vmem>>, vector<32x8xbf16>
    %cst_24 = arith.constant dense<0.000000e+00> : vector<8x8xf32>
    %50 = tpu.matmul %48, %49, %cst_24 {dimension_numbers = #tpu.dot_dimension_numbers<[1], [0], [0], [1], [0, 0, 1, 1], [], []>} : vector<8x32xbf16>, vector<32x8xbf16>, vector<8x8xf32> -> vector<8x8xf32>
    %c0_25 = arith.constant 0 : index
    %c0_26 = arith.constant 0 : index
    %51 = vector.load %arg8[%c0_25, %c0_26] : memref<1x8xf32, #tpu.memory_space<vmem>>, vector<1x8xf32>
    %52 = vector.broadcast %51 : vector<1x8xf32> to vector<8x8xf32>
    %53 = arith.addf %50, %52 : vector<8x8xf32>
    %cst_27 = arith.constant dense<0xFF800000> : vector<8xf32>
    %54 = vector.multi_reduction <maximumf>, %53, %cst_27 [1] : vector<8x8xf32> to vector<8xf32>
    %55 = vector.shape_cast %54 : vector<8xf32> to vector<8x1xf32>
    %56 = vector.broadcast %55 : vector<8x1xf32> to vector<8x8xf32>
    %57 = arith.subf %53, %56 : vector<8x8xf32>
    %58 = math.exp %57 : vector<8x8xf32>
    %cst_28 = arith.constant dense<0.000000e+00> : vector<8xf32>
    %59 = vector.multi_reduction <add>, %58, %cst_28 [1] : vector<8x8xf32> to vector<8xf32>
    %60 = vector.shape_cast %59 : vector<8xf32> to vector<8x1xf32>
    %61 = vector.broadcast %60 : vector<8x1xf32> to vector<8x8xf32>
    %62 = arith.divf %58, %61 : vector<8x8xf32>
    %c0_29 = arith.constant 0 : index
    %c0_30 = arith.constant 0 : index
    %63 = vector.load %arg9[%c0_29, %c0_30] : memref<8x8xf32, #tpu.memory_space<vmem>>, vector<8x8xf32>
    tpu.vector_store %arg9[%c0_29, %c0_30], %62 {strides = array<i32>} : memref<8x8xf32, #tpu.memory_space<vmem>>, vector<8x8xf32>,
    return
  }
}

</mosaic_0001>

<bundles_post_ra>
// kernel: typenet_forward.1
= control target key start
LH: loop header
LB: loop body
LE: loop exit
PB: predicated region body
PF: predicated region fallthrough
CT: control target
= control target key end

     0   :  { %vm85_vm0 = vcmask 261120   ;;  %v751_v3 = vmov 0   ;;  %s928_s0 = inlined_call_operand.vmem [shape: s32[9,1], index: 0, kind: input, shape index: {}]   ;;  %s929_s1 = inlined_call_operand.vmem [shape: bf16[64,32], index: 1, kind: input, shape index: {}]   ;;  %s930_s2 = inlined_call_operand.vmem [shape: bf16[32,32], index: 2, kind: input, shape index: {}]   ;;  %s931_s3 = inlined_call_operand.vmem [shape: f32[1,32], index: 3, kind: input, shape index: {}]   ;;  %s932_s4 = inlined_call_operand.vmem [shape: bf16[32,32], index: 4, kind: input, shape index: {}]   ;;  %s933_s5 = inlined_call_operand.vmem [shape: bf16[32,32], index: 5, kind: input, shape index: {}]   ;;  %s934_s6 = inlined_call_operand.vmem [shape: f32[1,32], index: 6, kind: input, shape index: {}]   ;;  %s935_s7 = inlined_call_operand.vmem [shape: bf16[32,8], index: 7, kind: input, shape index: {}]   ;;  %s936_s8 = inlined_call_operand.vmem [shape: f32[1,8], index: 8, kind: input, shape index: {}]   ;;  %s937_s9 = inlined_call_operand.hbm [shape: f32[8,8], index: 9, kind: output, shape index: {}]  }
   0x1   :  { %v707_v0 = vld [vmem:[%s930_s2] sm:$0xff]   ;;  %v708_v1 = vld [vmem:[%s930_s2 + $0x8] sm:$0xff]   ;;  %706 = vset.pattern.permute.xlu0 %v751_v3  ;;  %v711_v5 = vld [vmem:[%s929_s1 + $0x10] sm:$0xff]  }
   0x2   :  { %630 = vmatprep.subr.bf16.mxu0 %v707_v0  ;;  %v709_v2 = vld [vmem:[%s929_s1] sm:$0xff]   ;;  %v710_v4 = vld [vmem:[%s929_s1 + $0x8] sm:$0xff]  }
   0x3   :  { %631 = vmatpush3.bf16.msra.mxu0 %v707_v0  ;;  %634 = vmatprep.mubr.msk.bf16.mxu0 %vm85_vm0, %v709_v2  ;;  %v181_v6 = vld [vmem:[%s928_s0 + $0x8] sm:$0x1]  ;;  %v180_v7 = vld [vmem:[%s928_s0] sm:$0xff] }
   0x4   :  { %632 = vmatprep.subr.bf16.mxu0 %v708_v1  ;;  %186 = vperm.xlu0 %706, %v181_v6  }
   0x7   :  { %633 = vmatpush3.bf16.msra.mxu0 %v708_v1 }
   0xa   :  { %635 = vmatmul.mubr.msk.bf16.vlgmr.msra.gmra.mrb[0].mxu0 %vm85_vm0, %v710_v4 }
   0xb   :  { %14 = vsyncpa [#allocation3], 0  ;;  %638 = vmatprep.mubr.msk.bf16.mxu0 %vm85_vm0, %v711_v5  ;;  %183 = vperm.xlu0 %706, %v180_v7   ;;  %v712_v8 = vld [vmem:[%s929_s1 + $0x18] sm:$0xff]   ;;  %v752_v9 = vmov 0.0   ;;  %vm753_vm1 = vmmov 0   ;;  %v713_v10 = vld [vmem:[%s933_s5] sm:$0xff]   ;;  %v175_v23 = vlaneseq }
   0xc   :  { %642 = vmatprep.subr.bf16.mxu1 %v752_v9  ;;  %654 = vmatprep.subr.bf16.mxu0 %v752_v9  ;;  %v715_v11 = vld [vmem:[%s933_s5 + $0x8] sm:$0xff]   ;;  %v574_v12 = vld [vmem:[%s931_s3] ss:$0 sm:$0xff]  ;;  %vm199_vm5 = vcmask 523264   ;;  %vm547_vm6 = vcmask 64512  }
   0xd   :  { %650 = vmatprep.mubr.msk.bf16.mxu1 %vm753_vm1, %v752_v9  ;;  %655 = vmatpush3.bf16.msra.mxu0 %v713_v10  ;;  %v852_v32 = vshrl.u32 %v175_v23, 7  ;;  %v179_v35 = vand.u32 127, %v175_v23  ;;  %v714_v50 = vld [vmem:[%s932_s4] sm:$0xff]   ;;  %v716_v52 = vld [vmem:[%s932_s4 + $0x8] sm:$0xff]  }
   0xe   :  { %656 = vmatprep.subr.bf16.mxu0 %v752_v9  ;;  %v249_v0 = vld [vmem:[%s934_s6] sm:$0x1] }
   0xf   :  { %v177_v41 = vadd.s32 8, %v852_v32  ;;  %v312_v2 = vsub.s32 0, %v852_v32 }
  0x11   :  { %657 = vmatpush3.bf16.msra.mxu0 %v715_v11  ;;  %vm195_vm3 = vcmp.eq.s32.totalorder %v177_v41, 8 }
  0x12   :  { %639 = vmatmul.mubr.msk.bf16.gmra.mrb[4].mxu0 %vm85_vm0, %v712_v8  ;;  %670 = vmatprep.subr.bf16.mxu0 %v752_v9 }
  0x13   :  { %658 = vmatprep.mubr.msk.bf16.mxu0 %vm753_vm1, %v752_v9 }
  0x83   :  { %v187_v29 = vpop.permute.xlu0 %186 }
  0x84   :  { %vm189_vm2 = vcmp.eq.s32.totalorder %v179_v35, %v187_v29  ;;  %v718_v29 = vld [vmem:[%s935_s7 + $0x8] sm:$0xff]  }
  0x85   :  { %v586_v47 = vsel %vm189_vm2, 1.0, %v752_v9 }
  0x86   :  { %v197_v48 = vsel %vm195_vm3, 0.015625, %v586_v47 }
  0x8a   :  { %v184_v44 = vpop.permute.xlu0 %183 }
  0x8b   :  { %vm188_vm4 = vcmp.eq.s32.totalorder %v179_v35, %v184_v44  ;;  %v596_v35 = vld [vmem:[%s936_s8] ss:$0 sm:$0xff] }
  0x8c   :  { %v585_v49 = vsel %vm188_vm4, 1.0, %v752_v9 }
  0x8d   :  { %v198_v51 = vpack.c.bf16 %v197_v48, %v585_v49 }
  0xdd   :  { %v636_v13 = vpop.f32.mrb[0].mxu0 }
  0xde   :  { %v141_v14 = vadd.f32 %v636_v13, %v574_v12  ;;  %v132_v15 = vpop.f32.mrb[1].mxu0 }
  0xdf   :  { %v133_v16 = vadd.f32 %v574_v12, %v132_v15  ;;  %v637_v17 = vpop.f32.mrb[2].mxu0 }
  0xe0   :  { %v144_v18 = vadd.f32 %v637_v17, %v574_v12  ;;  %v135_v19 = vpop.f32.mrb[3].mxu0  ;;  %v165_v21 = vmax.f32 %v141_v14, 0.0 }
  0xe1   :  { %v136_v20 = vadd.f32 %v574_v12, %v135_v19  ;;  %v163_v24 = vmax.f32 %v133_v16, 0.0 }
  0xe2   :  { %v166_v22 = vmax.f32 %v144_v18, 0.0 }
  0xe3   :  { %v164_v25 = vmax.f32 %v136_v20, 0.0 }
  0xe4   :  { %v850_v26 = vpack.c.bf16 %v166_v22, %v165_v21 }
  0xe5   :  { %v171_v27 = vpack.c.bf16 %v164_v25, %v163_v24  ;;  %v640_v28 = vpop.f32.mrb[4].mxu0 }
  0xe6   :  { %v157_v30 = vadd.f32 %v640_v28, %v574_v12  ;;  %v148_v31 = vpop.f32.mrb[5].mxu0  ;;  %v377_v60 = vsel %vm85_vm0, %v850_v26, 0 }
  0xe7   :  { %v149_v33 = vadd.f32 %v574_v12, %v148_v31  ;;  %v641_v34 = vpop.f32.mrb[6].mxu0  ;;  %643 = vmatpush3.bf16.msra.mxu1 %v171_v27  ;;  %v374_v59 = vsel %vm85_vm0, %v171_v27, 0 }
  0xe8   :  { %v160_v36 = vadd.f32 %v641_v34, %v574_v12  ;;  %v151_v37 = vpop.f32.mrb[7].mxu0  ;;  %644 = vmatprep.subr.bf16.mxu1 %v752_v9  ;;  %v169_v39 = vmax.f32 %v157_v30, 0.0 }
  0xe9   :  { %v152_v38 = vadd.f32 %v574_v12, %v151_v37  ;;  %v167_v42 = vmax.f32 %v149_v33, 0.0 }
  0xea   :  { %v170_v40 = vmax.f32 %v160_v36, 0.0 }
  0xeb   :  { %v168_v43 = vmax.f32 %v152_v38, 0.0  ;;  %645 = vmatpush3.bf16.msra.mxu1 %v850_v26 }
  0xec   :  { %v174_v45 = vpack.c.bf16 %v170_v40, %v169_v39  ;;  %646 = vmatprep.subr.bf16.mxu1 %v752_v9 }
  0xed   :  { %v173_v46 = vpack.c.bf16 %v168_v43, %v167_v42 }
  0xee   :  { %v383_v62 = vsel %vm85_vm0, %v174_v45, 0 }
  0xef   :  { %647 = vmatpush3.bf16.msra.mxu1 %v173_v46  ;;  %v380_v61 = vsel %vm85_vm0, %v173_v46, 0 }
  0xf0   :  { %648 = vmatprep.subr.bf16.mxu1 %v752_v9 }
  0xf3   :  { %649 = vmatpush3.bf16.msra.mxu1 %v174_v45 }
  0xf4   :  { %662 = vmatprep.subr.bf16.mxu1 %v752_v9 }
  0xf6   :  { %651 = vmatmul.mubr.msk.bf16.vlgmr.msra.gmra.mrb[0].mxu1 %vm199_vm5, %v198_v51 }
  0xf7   :  { %663 = vmatpush3.bf16.msra.mxu1 %v714_v50  ;;  %666 = vmatprep.mubr.msk.bf16.mxu1 %vm753_vm1, %v752_v9 }
  0xf8   :  { %664 = vmatprep.subr.bf16.mxu1 %v752_v9 }
  0xfb   :  { %665 = vmatpush3.bf16.msra.mxu1 %v716_v52 }
  0xfc   :  { %682 = vmatprep.subr.bf16.mxu1 %v752_v9 }
 0x1c9   :  { %v237_v53 = vpop.f32.mrb[0].mxu1 }
 0x1ca   :  { %v305_v54 = vpack.c.bf16 %v237_v53, %v237_v53  ;;  %v652_v55 = vpop.f32.mrb[1].mxu1 }
 0x1cb   :  { %v240_v56 = vpop.f32.mrb[2].mxu1 }
 0x1cc   :  { %v244_v57 = vpack.c.bf16 %v240_v56, %v240_v56  ;;  %v653_v58 = vpop.f32.mrb[3].mxu1  ;;  %667 = vmatmul.mubr.msk.bf16.vlgmr.msra.gmra.mrb[4].mxu1 %vm85_vm0, %v305_v54 }
 0x1cd   :  { %683 = vmatpush3.bf16.msra.mxu1 %v171_v27  ;;  %690 = vmatprep.mubr.msk.bf16.mxu1 %vm753_vm1, %v752_v9  ;;  %v717_v27 = vld [vmem:[%s935_s7] sm:$0xff]   ;;  %s754_s7 = smov [#allocation2]  }
 0x1ce   :  { %659 = vmatmul.mubr.msk.bf16.vlgmr.msra.gmra.mrb[8].mxu0 %vm85_vm0, %v244_v57  ;;  %684 = vmatprep.subr.bf16.mxu1 %v752_v9  ;;  %s566_s8 = sshll.u32 %s754_s7, 4  ;;  %s567_s8 = int_to_ptr.vmem [resolvable:$true] %s566_s8 }
 0x1cf   :  { %671 = vmatpush3.bf16.xpose.msra.mxu0 %v374_v59  ;;  %678 = vmatprep.mubr.msk.bf16.mxu0 %vm753_vm1, %v752_v9  ;;  %s727_s15 = scalar_lea.vmem %s567_s8, 128  ;;  %p732_p1 = scmp.lt.s32.totalorder %s567_s8, %s567_s8 }
 0x1d0   :  { %672 = vmatprep.subr.bf16.mxu0 %v752_v9  ;;  %p728_p0 = scmp.ne.s32.totalorder %s567_s8, %s727_s15  ;;  %p733_p2 = scmp.lt.s32.totalorder %s727_s15, %s727_s15 }
 0x1d1   :  { %685 = vmatpush3.bf16.msra.mxu1 %v850_v26 }
 0x1d2   :  { %686 = vmatprep.subr.bf16.mxu1 %v752_v9  ;;  %p734_p3 = por %p733_p2, %p732_p1 }
 0x1d4   :  { %p735_p4 = pnand %p734_p3, %p728_p0 }
 0x1d5   :  { %687 = vmatpush3.bf16.msra.mxu1 %v173_v46 }
 0x1d6   :  { %688 = vmatprep.subr.bf16.mxu1 %v752_v9 }
 0x1d7   :  { %673 = vmatpush3.bf16.xpose.msra.mxu0 %v377_v60 }
 0x1d8   :  { %674 = vmatprep.subr.bf16.mxu0 %v752_v9 }
 0x1d9   :  { %689 = vmatpush3.bf16.msra.mxu1 %v174_v45 }
 0x1da   :  { %694 = vmatprep.subr.bf16.mxu1 %v752_v9 }
 0x1df   :  { %675 = vmatpush3.bf16.xpose.msra.mxu0 %v380_v61 }
 0x1e0   :  { %676 = vmatprep.subr.bf16.mxu0 %v752_v9 }
 0x1e7   :  { %677 = vmatpush3.bf16.xpose.msra.mxu0 %v383_v62 }
 0x29f   :  { %v363_v63 = vpop.f32.mrb[4].mxu1 }
 0x2a0   :  { %v668_v1 = vpop.f32.mrb[5].mxu1 }
 0x2a1   :  { %v299_v3 = vpop.f32.mrb[8].mxu0  ;;  %v366_v4 = vpop.f32.mrb[6].mxu1 }
 0x2a2   :  { %v300_v5 = vadd.f32 %v299_v3, %v249_v0  ;;  %v660_v6 = vpop.f32.mrb[9].mxu0  ;;  %v669_v7 = vpop.f32.mrb[7].mxu1 }
 0x2a3   :  { %v302_v8 = vpop.f32.mrb[10].mxu0 }
 0x2a4   :  { %v313_v10 = vrot.slane %v300_v5, %v312_v2  ;;  %v661_v11 = vpop.f32.mrb[11].mxu0 }
 0x2a6   :  { %v364_v12 = vadd.f32 %v363_v63, %v313_v10 }
 0x2a8   :  { %v369_v13 = vpack.c.bf16 %v364_v12, %v364_v12 }
 0x2aa   :  { %679 = vmatmul.mubr.msk.bf16.vlgmr.msra.gmra.mrb[12].mxu0 %vm85_vm0, %v369_v13 }
 0x37d   :  { %v419_v14 = vpop.f32.mrb[12].mxu0 }
 0x37e   :  { %v680_v15 = vpop.f32.mrb[13].mxu0  ;;  %v425_v16 = vsel %vm199_vm5, %v419_v14, -inf }
 0x37f   :  { %426 = vmax.xlane.f32.xlu1 %v425_v16  ;;  %v422_v17 = vpop.f32.mrb[14].mxu0 }
 0x380   :  { %v681_v18 = vpop.f32.mrb[15].mxu0 }
 0x40c   :  { %v427_v19 = vpop.xlane.xlu1 %426 }
 0x40d   :  { %v428_v20 = vsub.f32 %v419_v14, %v427_v19 }
 0x40f   :  { %v429_v21 = vmul.f32 1.442695, %v428_v20 }
 0x411   :  { %719 = vpow2.f32 %v429_v21 }
 0x41b   :  { %v720_v22 = vpop.eup %719 }
 0x41c   :  { %v431_v23 = vsel %vm199_vm5, %v720_v22, 0.0 }
 0x41d   :  { %432 = vadd.xlane.f32.xlu1 %v431_v23 }
 0x4aa   :  { %v433_v24 = vpop.xlane.xlu1 %432 }
 0x4ab   :  { %721 = vrcp.f32 %v433_v24 }
 0x4b5   :  { %v722_v25 = vpop.eup %721 }
 0x4b6   :  { %v435_v26 = vmul.f32 %v722_v25, %v720_v22 }
 0x4b8   :  { %v436_v28 = vpack.c.bf16 %v435_v26, %v435_v26 }
 0x4ba   :  { %691 = vmatmul.mubr.msk.bf16.vlgmr.msra.gmra.mrb[8].mxu1 %vm199_vm5, %v436_v28 }
 0x4bb   :  { %695 = vmatpush3.bf16.msra.mxu1 %v717_v27  ;;  %698 = vmatprep.mubr.msk.bf16.mxu1 %vm753_vm1, %v752_v9 }
 0x4bc   :  { %696 = vmatprep.subr.bf16.mxu1 %v752_v9 }
 0x4bf   :  { %697 = vmatpush3.bf16.msra.mxu1 %v718_v29 }
 0x58d   :  { %v474_v30 = vpop.f32.mrb[8].mxu1 }
 0x58e   :  { %v480_v31 = vpack.c.bf16 %v474_v30, %v474_v30  ;;  %v692_v32 = vpop.f32.mrb[9].mxu1 }
 0x58f   :  { %v477_v33 = vpop.f32.mrb[10].mxu1 }
 0x590   :  { %v693_v34 = vpop.f32.mrb[11].mxu1  ;;  %699 = vmatmul.mubr.msk.bf16.vlgmr.msra.gmra.mrb[12].mxu1 %vm85_vm0, %v480_v31 }
 0x663   :  { %v541_v36 = vpop.f32.mrb[12].mxu1 }
 0x664   :  { %v542_v37 = vadd.f32 %v596_v35, %v541_v36  ;;  %v700_v38 = vpop.f32.mrb[13].mxu1 }
 0x665   :  { %v544_v39 = vpop.f32.mrb[14].mxu1 }
 0x666   :  { %v701_v40 = vpop.f32.mrb[15].mxu1  ;;  %v548_v9 = vsel %vm547_vm6, %v542_v37, -inf }
 0x667   :  { %549 = vmax.xlane.f32.xlu0 %v548_v9 }
 0x6f4   :  { %v550_v41 = vpop.xlane.xlu0 %549 }
 0x6f5   :  { %v551_v42 = vsub.f32 %v542_v37, %v550_v41 }
 0x6f7   :  { %v552_v43 = vmul.f32 1.442695, %v551_v42 }
 0x6f9   :  { %723 = vpow2.f32 %v552_v43 }
 0x703   :  { %v724_v44 = vpop.eup %723 }
 0x704   :  { %v554_v45 = vsel %vm547_vm6, %v724_v44, 0.0 }
 0x705   :  { %555 = vadd.xlane.f32.xlu1 %v554_v45 }
 0x792   :  { %v556_v46 = vpop.xlane.xlu1 %555 }
 0x793   :  { %725 = vrcp.f32 %v556_v46 }
 0x79d   :  { %v726_v47 = vpop.eup %725 }
 0x79e   :  { %v558_v48 = vmul.f32 %v726_v47, %v724_v44 }
 0x7a0   :  { %559 = vst.msk [vmem:[#allocation2] sm:$0xff] %vm547_vm6, %v558_v48 }
 0x7a1   :  { %738 = shalt.err (!%p735_p4)
}
 0x7a2   :  { %s739_s18 = scalar_lea.hbm %s937_s9, 128 }
 0x7a3   :  { %p740_p5 = scmp.ne.s32.totalorder %s937_s9, %s739_s18  ;;  %p743_p6 = scmp.lt.u32.totalorder %s739_s18, %s937_s9 }
 0x7a5   :  { %p745_p7 = pnand %p743_p6, %p740_p5 }
 0x7a7   :  { %748 = shalt.err (!%p745_p7)
}
 0x7a8   :  { %569 = dma.vmem_to_hbm [thread:$0]  %s567_s8, 128, %s937_s9, [#allocation3]  }
 0x7a9   :  { %749 = dma.done.wait [#allocation3], 128  }
 0x7aa   :  { %750 = vsyncadd [#allocation3], 4294967168 }
 0x7ab   :  { %573 = vsyncpa [#allocation3], 1 }

</bundles_post_ra>
